<compile_context>
chip_gen: v7x
topology: tpu7x:2x2x1
jax: 0.10.0
libtpu: 0.0.40
codegen_flags: <defaults>
</compile_context>

<pallas_src>
import functools

import jax
import jax.numpy as jnp
from jax.experimental import pallas as pl
from jax.experimental.pallas import tpu as pltpu


# ----------------------------------------------------------------------------
# Pallas kernel: one bidirectional LSTM layer, whole sequence, single grid pt.
# ----------------------------------------------------------------------------
def _bilstm_layer_kernel(x_ref, wx_ref, wh_ref, b_ref, y_ref, hT_ref, gx_scr,
                         *, T, B, H):
    """Fused fwd+bwd LSTM layer.

    x_ref : (T*B, Din)   time-major inputs (batch already padded to B)
    wx_ref: (Din, 8H)    input weights, columns ordered [gate i,f,g,o][dir f,b][H]
    wh_ref: (2H, 8H)     recurrent weights, per-gate 2x2 block-diagonal over dir
    b_ref : (1, 8H)      b_ih + b_hh, same column layout as wx
    y_ref : (T*B, 2H)    outputs, [:, :H] = fwd, [:, H:] = bwd
    hT_ref: (B, 2H)      final hidden states [h_fwd(T-1) | h_bwd(time 0)]
    gx_scr: (T*B, 8H)    VMEM scratch for the hoisted input projection
    """
    G = 8 * H

    # ---- Phase 1: batched input projection for every timestep & both dirs.
    gx_scr[...] = (
        jnp.dot(x_ref[...], wx_ref[...], preferred_element_type=jnp.float32)
        + b_ref[...])

    # Lanes with (lane mod 2H) < H belong to the forward cell.  Hoisted out of
    # the loop (broadcast_in_dim is not CSE'd by JAX).
    lane = jax.lax.broadcasted_iota(jnp.int32, (B, G), 1)
    is_fwd_lane = (lane % (2 * H)) < H

    h0 = jnp.zeros((B, 2 * H), jnp.float32)
    c0 = jnp.zeros((B, 2 * H), jnp.float32)

    def step(t, carry):
        h, c = carry                                     # (B, 2H) each: [fwd | bwd]
        rf = pl.multiple_of(t * B, B)                    # fwd cell consumes time t
        rb = pl.multiple_of((T - 1 - t) * B, B)          # bwd cell consumes time T-1-t
        gx_f = gx_scr[pl.ds(rf, B), :]
        gx_b = gx_scr[pl.ds(rb, B), :]
        gates = (jnp.where(is_fwd_lane, gx_f, gx_b)
                 + jnp.dot(h, wh_ref[...], preferred_element_type=jnp.float32))
        # Gate order i, f, g, o (PyTorch); each slice is (B, 2H) = [fwd | bwd].
        i_g = jax.nn.sigmoid(gates[:, 0 * 2 * H:1 * 2 * H])
        f_g = jax.nn.sigmoid(gates[:, 1 * 2 * H:2 * 2 * H])
        g_g = jnp.tanh(gates[:, 2 * 2 * H:3 * 2 * H])
        o_g = jax.nn.sigmoid(gates[:, 3 * 2 * H:4 * 2 * H])
        c_new = f_g * c + i_g * g_g
        h_new = o_g * jnp.tanh(c_new)
        # fwd half is the output at time t, bwd half is the output at time T-1-t.
        y_ref[pl.ds(rf, B), 0:H] = h_new[:, 0:H]
        y_ref[pl.ds(rb, B), H:2 * H] = h_new[:, H:2 * H]
        return h_new, c_new

    h_fin, _ = jax.lax.fori_loop(0, T, step, (h0, c0), unroll=True)
    hT_ref[...] = h_fin          # single store: [h_fwd final | h_bwd final]


def bilstm_layer(x2d, wx, wh, b, *, T, B_pad, H):
    """Run one fused bidirectional LSTM layer with a single pallas_call."""
    TB, din = x2d.shape
    G = 8 * H
    y, h_fin = pl.pallas_call(
        functools.partial(_bilstm_layer_kernel, T=T, B=B_pad, H=H),
        grid=(1,),
        in_specs=[
            pl.BlockSpec((TB, din), lambda i: (0, 0)),
            pl.BlockSpec((din, G), lambda i: (0, 0)),
            pl.BlockSpec((2 * H, G), lambda i: (0, 0)),
            pl.BlockSpec((1, G), lambda i: (0, 0)),
        ],
        out_specs=[
            pl.BlockSpec((TB, 2 * H), lambda i: (0, 0)),
            pl.BlockSpec((B_pad, 2 * H), lambda i: (0, 0)),
        ],
        out_shape=[
            jax.ShapeDtypeStruct((TB, 2 * H), jnp.float32),
            jax.ShapeDtypeStruct((B_pad, 2 * H), jnp.float32),
        ],
        scratch_shapes=[pltpu.VMEM((TB, G), jnp.float32)],
        compiler_params=pltpu.CompilerParams(
            dimension_semantics=("arbitrary",)),
    )(x2d, wx, wh, b)
    return y, h_fin


# ----------------------------------------------------------------------------
# One-time weight packing (outside the hot path).
# ----------------------------------------------------------------------------
def prepare_params(raw_params):
    """Pack nn.LSTM-layout weights into the kernel layout.

    Per layer input (PyTorch layout, biases pre-summed b_ih + b_hh):
      wih_f/wih_b: (4H, Din), whh_f/whh_b: (4H, H), b_f/b_b: (4H,)
    Per layer output:
      wx: (Din, 8H)  columns ordered [gate][dir][unit]
      wh: (2H, 8H)   per-gate block-diagonal over directions
      b : (1, 8H)
    """
    packed = []
    for p in raw_params:
        H = p["whh_f"].shape[1]
        din = p["wih_f"].shape[1]

        wif = p["wih_f"].reshape(4, H, din)
        wib = p["wih_b"].reshape(4, H, din)
        wx = jnp.stack([wif, wib], axis=1).reshape(8 * H, din).T   # (Din, 8H)

        whf = p["whh_f"].reshape(4, H, H)
        whb = p["whh_b"].reshape(4, H, H)
        zero = jnp.zeros((H, H), jnp.float32)
        blocks = []
        for k in range(4):
            top = jnp.concatenate([whf[k].T, zero], axis=1)        # h_fwd rows
            bot = jnp.concatenate([zero, whb[k].T], axis=1)        # h_bwd rows
            blocks.append(jnp.concatenate([top, bot], axis=0))     # (2H, 2H)
        wh = jnp.concatenate(blocks, axis=1)                       # (2H, 8H)

        b = jnp.stack([p["b_f"].reshape(4, H), p["b_b"].reshape(4, H)],
                      axis=1).reshape(1, 8 * H)
        packed.append({"wx": wx, "wh": wh, "b": b, "H": H})
    return packed


# ----------------------------------------------------------------------------
# Encoder forward: stacked bidirectional LSTM (inference semantics).
# ----------------------------------------------------------------------------
def encoder_forward(inputs, packed_params):
    """inputs: (T, B, input_size). Returns (outputs, h_cat) like the torch module."""
    T, B, din0 = inputs.shape
    B_pad = ((B + 7) // 8) * 8                 # sublane multiple; padded rows discarded
    x = inputs.astype(jnp.float32)
    if B_pad != B:
        x = jnp.pad(x, ((0, 0), (0, B_pad - B), (0, 0)))
    x2d = x.reshape(T * B_pad, din0)

    h_fin = None
    for p in packed_params:
        x2d, h_fin = bilstm_layer(x2d, p["wx"], p["wh"], p["b"],
                                  T=T, B_pad=B_pad, H=p["H"])
        # TODO(synk): nn.LSTM inter-layer dropout is training-only; inference path has none.

    H_last = packed_params[-1]["H"]
    outputs = x2d.reshape(T, B_pad, 2 * H_last)[:, :B, :]
    h_cat = h_fin[:B, :]                       # == ht[-2:].transpose(0,1).view(B, -1)
    return outputs, h_cat


# ----------------------------------------------------------------------------
# Pure-JAX reference (correctness check), PyTorch-layout params.
# ----------------------------------------------------------------------------
def _ref_lstm_dir(x, w_ih, w_hh, bias, reverse):
    T, B, _ = x.shape
    H = w_hh.shape[1]
    xs = x[::-1] if reverse else x

    def step(carry, x_t):
        h, c = carry
        gates = x_t @ w_ih.T + h @ w_hh.T + bias
        i_g = jax.nn.sigmoid(gates[:, 0 * H:1 * H])
        f_g = jax.nn.sigmoid(gates[:, 1 * H:2 * H])
        g_g = jnp.tanh(gates[:, 2 * H:3 * H])
        o_g = jax.nn.sigmoid(gates[:, 3 * H:4 * H])
        c_new = f_g * c + i_g * g_g
        h_new = o_g * jnp.tanh(c_new)
        return (h_new, c_new), h_new

    init = (jnp.zeros((B, H), jnp.float32), jnp.zeros((B, H), jnp.float32))
    (h_fin, _), ys = jax.lax.scan(step, init, xs)
    if reverse:
        ys = ys[::-1]
    return ys, h_fin


def _ref_encoder(inputs, params):
    x = inputs
    h_f = h_b = None
    for p in params:
        y_f, h_f = _ref_lstm_dir(x, p["wih_f"], p["whh_f"], p["b_f"], reverse=False)
        y_b, h_b = _ref_lstm_dir(x, p["wih_b"], p["whh_b"], p["b_b"], reverse=True)
        x = jnp.concatenate([y_f, y_b], axis=-1)
    return x, jnp.concatenate([h_f, h_b], axis=-1)


# ----------------------------------------------------------------------------
# Deterministic parameter construction (mirrors nn.LSTM shapes; b = b_ih + b_hh).
# ----------------------------------------------------------------------------
def make_params(key, num_layers, input_size, H):
    params = []
    scale = 1.0 / jnp.sqrt(jnp.asarray(H, jnp.float32))
    for layer in range(num_layers):
        d_in = input_size if layer == 0 else 2 * H
        key, *ks = jax.random.split(key, 7)
        params.append({
            "wih_f": jax.random.uniform(ks[0], (4 * H, d_in), jnp.float32, -scale, scale),
            "whh_f": jax.random.uniform(ks[1], (4 * H, H), jnp.float32, -scale, scale),
            "b_f":   jax.random.uniform(ks[2], (4 * H,), jnp.float32, -scale, scale),
            "wih_b": jax.random.uniform(ks[3], (4 * H, d_in), jnp.float32, -scale, scale),
            "whh_b": jax.random.uniform(ks[4], (4 * H, H), jnp.float32, -scale, scale),
            "b_b":   jax.random.uniform(ks[5], (4 * H,), jnp.float32, -scale, scale),
        })
    return params


if __name__ == "__main__":
    # config: embedding_size=31 (+1 feature => input_size 32), hidden_size=32,
    # num_layers=2, dropout ignored (inference).
    config = {"embedding_size": 31, "hidden_size": 32, "num_layers": 2, "dropout": 0.0}
    input_size = config["embedding_size"] + 1        # use_features=True
    H = config["hidden_size"] // 2                   # per-direction hidden size
    num_layers = config["num_layers"]

    T, B = 8, 4                                      # seq_len, batch (batch_first=False)

    key = jax.random.PRNGKey(0)
    key, k_in = jax.random.split(key)
    inputs = jax.random.normal(k_in, (T, B, input_size), jnp.float32)
    raw_params = make_params(key, num_layers, input_size, H)
    packed_params = prepare_params(raw_params)       # one-time weight packing

    outputs, h_cat = encoder_forward(inputs, packed_params)
    outputs, h_cat = jax.block_until_ready((outputs, h_cat))

    ref_out, ref_h = _ref_encoder(inputs, raw_params)

    assert outputs.shape == (T, B, config["hidden_size"])
    assert h_cat.shape == (B, config["hidden_size"])
    assert jnp.allclose(outputs, ref_out, rtol=2e-5, atol=2e-5)
    assert jnp.allclose(h_cat, ref_h, rtol=2e-5, atol=2e-5)

    print("KERNEL_OK")
</pallas_src>

<mosaic_0001>
module attributes {stable_mosaic.version = 11 : i64} {
  func.func @_bilstm_layer_kernel(%arg0: i32, %arg1: memref<64x32xf32, #tpu.memory_space<vmem>>, %arg2: memref<32x128xf32, #tpu.memory_space<vmem>>, %arg3: memref<32x128xf32, #tpu.memory_space<vmem>>, %arg4: memref<1x128xf32, #tpu.memory_space<vmem>>, %arg5: memref<64x32xf32, #tpu.memory_space<vmem>>, %arg6: memref<8x32xf32, #tpu.memory_space<vmem>>, %arg7: memref<64x128xf32, #tpu.memory_space<vmem>>) attributes {dimension_semantics = [#tpu.dimension_semantics<arbitrary>], iteration_bounds = array<i64: 1>, scalar_prefetch = 0 : i64, scratch_operands = 1 : i64, tpu.core_type = #tpu.core_type<tc>, window_params = [{pipeline_mode = #tpu.pipeline_mode<synchronous>, transform_indices = @transform_0, window_bounds = array<i64: 64, 32>}, {pipeline_mode = #tpu.pipeline_mode<synchronous>, transform_indices = @transform_1, window_bounds = array<i64: 32, 128>}, {pipeline_mode = #tpu.pipeline_mode<synchronous>, transform_indices = @transform_2, window_bounds = array<i64: 32, 128>}, {pipeline_mode = #tpu.pipeline_mode<synchronous>, transform_indices = @transform_3, window_bounds = array<i64: 1, 128>}, {pipeline_mode = #tpu.pipeline_mode<synchronous>, transform_indices = @transform_4, window_bounds = array<i64: 64, 32>}, {pipeline_mode = #tpu.pipeline_mode<synchronous>, transform_indices = @transform_5, window_bounds = array<i64: 8, 32>}]} {
    %c0 = arith.constant 0 : index
    %c0_0 = arith.constant 0 : index
    %0 = vector.load %arg1[%c0, %c0_0] : memref<64x32xf32, #tpu.memory_space<vmem>>, vector<64x32xf32>
    %c0_1 = arith.constant 0 : index
    %c0_2 = arith.constant 0 : index
    %1 = vector.load %arg2[%c0_1, %c0_2] : memref<32x128xf32, #tpu.memory_space<vmem>>, vector<32x128xf32>
    %cst = arith.constant dense<0.000000e+00> : vector<64x128xf32>
    %2 = tpu.matmul %0, %1, %cst {dimension_numbers = #tpu.dot_dimension_numbers<[1], [0], [0], [1], [0, 0, 1, 1], [], []>} : vector<64x32xf32>, vector<32x128xf32>, vector<64x128xf32> -> vector<64x128xf32>
    %c0_3 = arith.constant 0 : index
    %c0_4 = arith.constant 0 : index
    %3 = vector.load %arg4[%c0_3, %c0_4] : memref<1x128xf32, #tpu.memory_space<vmem>>, vector<1x128xf32>
    %4 = vector.broadcast %3 : vector<1x128xf32> to vector<64x128xf32>
    %5 = arith.addf %2, %4 : vector<64x128xf32>
    %c0_5 = arith.constant 0 : index
    %c0_6 = arith.constant 0 : index
    %6 = vector.load %arg7[%c0_5, %c0_6] : memref<64x128xf32, #tpu.memory_space<vmem>>, vector<64x128xf32>
    tpu.vector_store %arg7[%c0_5, %c0_6], %5 {strides = array<i32>} : memref<64x128xf32, #tpu.memory_space<vmem>>, vector<64x128xf32>,
    %7 = tpu.iota {dimensions = array<i32: 1>} : vector<8x128xi32>
    %c32_i32 = arith.constant 32 : i32
    %c0_i32 = arith.constant 0 : i32
    %8 = arith.cmpi eq, %c32_i32, %c0_i32 : i32
    %c1_i32 = arith.constant 1 : i32
    %9 = arith.select %8, %c1_i32, %c32_i32 : i32
    %10 = vector.broadcast %9 : i32 to vector<8x128xi32>
    %11 = arith.remsi %7, %10 : vector<8x128xi32>
    %c0_i32_7 = arith.constant 0 : i32
    %12 = vector.broadcast %c0_i32_7 : i32 to vector<8x128xi32>
    %13 = arith.cmpi ne, %11, %12 : vector<8x128xi32>
    %c0_i32_8 = arith.constant 0 : i32
    %14 = vector.broadcast %c0_i32_8 : i32 to vector<8x128xi32>
    %15 = arith.cmpi slt, %11, %14 : vector<8x128xi32>
    %c0_i32_9 = arith.constant 0 : i32
    %16 = arith.cmpi slt, %9, %c0_i32_9 : i32
    %17 = vector.broadcast %16 : i1 to vector<8x128xi1>
    %18 = vector.broadcast %17 : vector<8x128xi1> to vector<8x128xi1>
    %19 = arith.xori %15, %18 : vector<8x128xi1>
    %20 = arith.andi %19, %13 : vector<8x128xi1>
    %21 = vector.broadcast %9 : i32 to vector<8x128xi32>
    %22 = arith.addi %11, %21 : vector<8x128xi32>
    %23 = arith.select %20, %22, %11 : vector<8x128xi1>, vector<8x128xi32>
    %c16_i32 = arith.constant 16 : i32
    %24 = vector.broadcast %c16_i32 : i32 to vector<8x128xi32>
    %25 = arith.cmpi slt, %23, %24 : vector<8x128xi32>
    %cst_10 = arith.constant 0.000000e+00 : f32
    %26 = vector.broadcast %cst_10 : f32 to vector<8x32xf32>
    %cst_11 = arith.constant 0.000000e+00 : f32
    %27 = vector.broadcast %cst_11 : f32 to vector<8x32xf32>
    %c0_i32_12 = arith.constant 0 : i32
    %c8_i32 = arith.constant 8 : i32
    %28 = arith.muli %c0_i32_12, %c8_i32 : i32
    %29 = tpu.assume_multiple %28, 8 : i32
    %c7_i32 = arith.constant 7 : i32
    %30 = arith.subi %c7_i32, %c0_i32_12 : i32
    %c8_i32_13 = arith.constant 8 : i32
    %31 = arith.muli %30, %c8_i32_13 : i32
    %32 = tpu.assume_multiple %31, 8 : i32
    %33 = arith.index_cast %29 : i32 to index
    %c0_14 = arith.constant 0 : index
    %34 = vector.load %arg7[%33, %c0_14] : memref<64x128xf32, #tpu.memory_space<vmem>>, vector<8x128xf32>
    %35 = arith.index_cast %32 : i32 to index
    %c0_15 = arith.constant 0 : index
    %36 = vector.load %arg7[%35, %c0_15] : memref<64x128xf32, #tpu.memory_space<vmem>>, vector<8x128xf32>
    %37 = arith.select %25, %34, %36 : vector<8x128xi1>, vector<8x128xf32>
    %c0_16 = arith.constant 0 : index
    %c0_17 = arith.constant 0 : index
    %38 = vector.load %arg3[%c0_16, %c0_17] : memref<32x128xf32, #tpu.memory_space<vmem>>, vector<32x128xf32>
    %cst_18 = arith.constant dense<0.000000e+00> : vector<8x128xf32>
    %39 = tpu.matmul %26, %38, %cst_18 {dimension_numbers = #tpu.dot_dimension_numbers<[1], [0], [0], [1], [0, 0, 1, 1], [], []>} : vector<8x32xf32>, vector<32x128xf32>, vector<8x128xf32> -> vector<8x128xf32>
    %40 = arith.addf %37, %39 : vector<8x128xf32>
    %41 = vector.extract_strided_slice %40 {offsets = [0, 0], sizes = [8, 32], strides = [1, 1]} : vector<8x128xf32> to vector<8x32xf32>
    %42 = arith.negf %41 : vector<8x32xf32>
    %43 = math.exp %42 : vector<8x32xf32>
    %cst_19 = arith.constant 1.000000e+00 : f32
    %44 = vector.broadcast %cst_19 : f32 to vector<8x32xf32>
    %45 = arith.addf %44, %43 : vector<8x32xf32>
    %46 = arith.divf %44, %45 : vector<8x32xf32>
    %47 = vector.extract_strided_slice %40 {offsets = [0, 32], sizes = [8, 32], strides = [1, 1]} : vector<8x128xf32> to vector<8x32xf32>
    %48 = arith.negf %47 : vector<8x32xf32>
    %49 = math.exp %48 : vector<8x32xf32>
    %cst_20 = arith.constant 1.000000e+00 : f32
    %50 = vector.broadcast %cst_20 : f32 to vector<8x32xf32>
    %51 = arith.addf %50, %49 : vector<8x32xf32>
    %52 = arith.divf %50, %51 : vector<8x32xf32>
    %53 = vector.extract_strided_slice %40 {offsets = [0, 64], sizes = [8, 32], strides = [1, 1]} : vector<8x128xf32> to vector<8x32xf32>
    %54 = math.tanh %53 : vector<8x32xf32>
    %55 = vector.extract_strided_slice %40 {offsets = [0, 96], sizes = [8, 32], strides = [1, 1]} : vector<8x128xf32> to vector<8x32xf32>
    %56 = arith.negf %55 : vector<8x32xf32>
    %57 = math.exp %56 : vector<8x32xf32>
    %cst_21 = arith.constant 1.000000e+00 : f32
    %58 = vector.broadcast %cst_21 : f32 to vector<8x32xf32>
    %59 = arith.addf %58, %57 : vector<8x32xf32>
    %60 = arith.divf %58, %59 : vector<8x32xf32>
    %61 = arith.mulf %52, %27 : vector<8x32xf32>
    %62 = arith.mulf %46, %54 : vector<8x32xf32>
    %63 = arith.addf %61, %62 : vector<8x32xf32>
    %64 = math.tanh %63 : vector<8x32xf32>
    %65 = arith.mulf %60, %64 : vector<8x32xf32>
    %66 = vector.extract_strided_slice %65 {offsets = [0, 0], sizes = [8, 16], strides = [1, 1]} : vector<8x32xf32> to vector<8x16xf32>
    %67 = arith.index_cast %29 : i32 to index
    %c0_22 = arith.constant 0 : index
    %68 = vector.load %arg5[%67, %c0_22] : memref<64x32xf32, #tpu.memory_space<vmem>>, vector<8x16xf32>
    tpu.vector_store %arg5[%67, %c0_22], %66 {strides = array<i32>} : memref<64x32xf32, #tpu.memory_space<vmem>>, vector<8x16xf32>,
    %69 = vector.extract_strided_slice %65 {offsets = [0, 16], sizes = [8, 16], strides = [1, 1]} : vector<8x32xf32> to vector<8x16xf32>
    %70 = arith.index_cast %32 : i32 to index
    %c16 = arith.constant 16 : index
    %71 = vector.load %arg5[%70, %c16] : memref<64x32xf32, #tpu.memory_space<vmem>>, vector<8x16xf32>
    tpu.vector_store %arg5[%70, %c16], %69 {strides = array<i32>} : memref<64x32xf32, #tpu.memory_space<vmem>>, vector<8x16xf32>,
    %c1_i32_23 = arith.constant 1 : i32
    %c8_i32_24 = arith.constant 8 : i32
    %72 = arith.muli %c1_i32_23, %c8_i32_24 : i32
    %73 = tpu.assume_multiple %72, 8 : i32
    %c7_i32_25 = arith.constant 7 : i32
    %74 = arith.subi %c7_i32_25, %c1_i32_23 : i32
    %c8_i32_26 = arith.constant 8 : i32
    %75 = arith.muli %74, %c8_i32_26 : i32
    %76 = tpu.assume_multiple %75, 8 : i32
    %77 = arith.index_cast %73 : i32 to index
    %c0_27 = arith.constant 0 : index
    %78 = vector.load %arg7[%77, %c0_27] : memref<64x128xf32, #tpu.memory_space<vmem>>, vector<8x128xf32>
    %79 = arith.index_cast %76 : i32 to index
    %c0_28 = arith.constant 0 : index
    %80 = vector.load %arg7[%79, %c0_28] : memref<64x128xf32, #tpu.memory_space<vmem>>, vector<8x128xf32>
    %81 = arith.select %25, %78, %80 : vector<8x128xi1>, vector<8x128xf32>
    %c0_29 = arith.constant 0 : index
    %c0_30 = arith.constant 0 : index
    %82 = vector.load %arg3[%c0_29, %c0_30] : memref<32x128xf32, #tpu.memory_space<vmem>>, vector<32x128xf32>
    %cst_31 = arith.constant dense<0.000000e+00> : vector<8x128xf32>
    %83 = tpu.matmul %65, %82, %cst_31 {dimension_numbers = #tpu.dot_dimension_numbers<[1], [0], [0], [1], [0, 0, 1, 1], [], []>} : vector<8x32xf32>, vector<32x128xf32>, vector<8x128xf32> -> vector<8x128xf32>
    %84 = arith.addf %81, %83 : vector<8x128xf32>
    %85 = vector.extract_strided_slice %84 {offsets = [0, 0], sizes = [8, 32], strides = [1, 1]} : vector<8x128xf32> to vector<8x32xf32>
    %86 = arith.negf %85 : vector<8x32xf32>
    %87 = math.exp %86 : vector<8x32xf32>
    %cst_32 = arith.constant 1.000000e+00 : f32
    %88 = vector.broadcast %cst_32 : f32 to vector<8x32xf32>
    %89 = arith.addf %88, %87 : vector<8x32xf32>
    %90 = arith.divf %88, %89 : vector<8x32xf32>
    %91 = vector.extract_strided_slice %84 {offsets = [0, 32], sizes = [8, 32], strides = [1, 1]} : vector<8x128xf32> to vector<8x32xf32>
    %92 = arith.negf %91 : vector<8x32xf32>
    %93 = math.exp %92 : vector<8x32xf32>
    %cst_33 = arith.constant 1.000000e+00 : f32
    %94 = vector.broadcast %cst_33 : f32 to vector<8x32xf32>
    %95 = arith.addf %94, %93 : vector<8x32xf32>
    %96 = arith.divf %94, %95 : vector<8x32xf32>
    %97 = vector.extract_strided_slice %84 {offsets = [0, 64], sizes = [8, 32], strides = [1, 1]} : vector<8x128xf32> to vector<8x32xf32>
    %98 = math.tanh %97 : vector<8x32xf32>
    %99 = vector.extract_strided_slice %84 {offsets = [0, 96], sizes = [8, 32], strides = [1, 1]} : vector<8x128xf32> to vector<8x32xf32>
    %100 = arith.negf %99 : vector<8x32xf32>
    %101 = math.exp %100 : vector<8x32xf32>
    %cst_34 = arith.constant 1.000000e+00 : f32
    %102 = vector.broadcast %cst_34 : f32 to vector<8x32xf32>
    %103 = arith.addf %102, %101 : vector<8x32xf32>
    %104 = arith.divf %102, %103 : vector<8x32xf32>
    %105 = arith.mulf %96, %63 : vector<8x32xf32>
    %106 = arith.mulf %90, %98 : vector<8x32xf32>
    %107 = arith.addf %105, %106 : vector<8x32xf32>
    %108 = math.tanh %107 : vector<8x32xf32>
    %109 = arith.mulf %104, %108 : vector<8x32xf32>
    %110 = vector.extract_strided_slice %109 {offsets = [0, 0], sizes = [8, 16], strides = [1, 1]} : vector<8x32xf32> to vector<8x16xf32>
    %111 = arith.index_cast %73 : i32 to index
    %c0_35 = arith.constant 0 : index
    %112 = vector.load %arg5[%111, %c0_35] : memref<64x32xf32, #tpu.memory_space<vmem>>, vector<8x16xf32>
    tpu.vector_store %arg5[%111, %c0_35], %110 {strides = array<i32>} : memref<64x32xf32, #tpu.memory_space<vmem>>, vector<8x16xf32>,
    %113 = vector.extract_strided_slice %109 {offsets = [0, 16], sizes = [8, 16], strides = [1, 1]} : vector<8x32xf32> to vector<8x16xf32>
    %114 = arith.index_cast %76 : i32 to index
    %c16_36 = arith.constant 16 : index
    %115 = vector.load %arg5[%114, %c16_36] : memref<64x32xf32, #tpu.memory_space<vmem>>, vector<8x16xf32>
    tpu.vector_store %arg5[%114, %c16_36], %113 {strides = array<i32>} : memref<64x32xf32, #tpu.memory_space<vmem>>, vector<8x16xf32>,
    %c2_i32 = arith.constant 2 : i32
    %c8_i32_37 = arith.constant 8 : i32
    %116 = arith.muli %c2_i32, %c8_i32_37 : i32
    %117 = tpu.assume_multiple %116, 8 : i32
    %c7_i32_38 = arith.constant 7 : i32
    %118 = arith.subi %c7_i32_38, %c2_i32 : i32
    %c8_i32_39 = arith.constant 8 : i32
    %119 = arith.muli %118, %c8_i32_39 : i32
    %120 = tpu.assume_multiple %119, 8 : i32
    %121 = arith.index_cast %117 : i32 to index
    %c0_40 = arith.constant 0 : index
    %122 = vector.load %arg7[%121, %c0_40] : memref<64x128xf32, #tpu.memory_space<vmem>>, vector<8x128xf32>
    %123 = arith.index_cast %120 : i32 to index
    %c0_41 = arith.constant 0 : index
    %124 = vector.load %arg7[%123, %c0_41] : memref<64x128xf32, #tpu.memory_space<vmem>>, vector<8x128xf32>
    %125 = arith.select %25, %122, %124 : vector<8x128xi1>, vector<8x128xf32>
    %c0_42 = arith.constant 0 : index
    %c0_43 = arith.constant 0 : index
    %126 = vector.load %arg3[%c0_42, %c0_43] : memref<32x128xf32, #tpu.memory_space<vmem>>, vector<32x128xf32>
    %cst_44 = arith.constant dense<0.000000e+00> : vector<8x128xf32>
    %127 = tpu.matmul %109, %126, %cst_44 {dimension_numbers = #tpu.dot_dimension_numbers<[1], [0], [0], [1], [0, 0, 1, 1], [], []>} : vector<8x32xf32>, vector<32x128xf32>, vector<8x128xf32> -> vector<8x128xf32>
    %128 = arith.addf %125, %127 : vector<8x128xf32>
    %129 = vector.extract_strided_slice %128 {offsets = [0, 0], sizes = [8, 32], strides = [1, 1]} : vector<8x128xf32> to vector<8x32xf32>
    %130 = arith.negf %129 : vector<8x32xf32>
    %131 = math.exp %130 : vector<8x32xf32>
    %cst_45 = arith.constant 1.000000e+00 : f32
    %132 = vector.broadcast %cst_45 : f32 to vector<8x32xf32>
    %133 = arith.addf %132, %131 : vector<8x32xf32>
    %134 = arith.divf %132, %133 : vector<8x32xf32>
    %135 = vector.extract_strided_slice %128 {offsets = [0, 32], sizes = [8, 32], strides = [1, 1]} : vector<8x128xf32> to vector<8x32xf32>
    %136 = arith.negf %135 : vector<8x32xf32>
    %137 = math.exp %136 : vector<8x32xf32>
    %cst_46 = arith.constant 1.000000e+00 : f32
    %138 = vector.broadcast %cst_46 : f32 to vector<8x32xf32>
    %139 = arith.addf %138, %137 : vector<8x32xf32>
    %140 = arith.divf %138, %139 : vector<8x32xf32>
    %141 = vector.extract_strided_slice %128 {offsets = [0, 64], sizes = [8, 32], strides = [1, 1]} : vector<8x128xf32> to vector<8x32xf32>
    %142 = math.tanh %141 : vector<8x32xf32>
    %143 = vector.extract_strided_slice %128 {offsets = [0, 96], sizes = [8, 32], strides = [1, 1]} : vector<8x128xf32> to vector<8x32xf32>
    %144 = arith.negf %143 : vector<8x32xf32>
    %145 = math.exp %144 : vector<8x32xf32>
    %cst_47 = arith.constant 1.000000e+00 : f32
    %146 = vector.broadcast %cst_47 : f32 to vector<8x32xf32>
    %147 = arith.addf %146, %145 : vector<8x32xf32>
    %148 = arith.divf %146, %147 : vector<8x32xf32>
    %149 = arith.mulf %140, %107 : vector<8x32xf32>
    %150 = arith.mulf %134, %142 : vector<8x32xf32>
    %151 = arith.addf %149, %150 : vector<8x32xf32>
    %152 = math.tanh %151 : vector<8x32xf32>
    %153 = arith.mulf %148, %152 : vector<8x32xf32>
    %154 = vector.extract_strided_slice %153 {offsets = [0, 0], sizes = [8, 16], strides = [1, 1]} : vector<8x32xf32> to vector<8x16xf32>
    %155 = arith.index_cast %117 : i32 to index
    %c0_48 = arith.constant 0 : index
    %156 = vector.load %arg5[%155, %c0_48] : memref<64x32xf32, #tpu.memory_space<vmem>>, vector<8x16xf32>
    tpu.vector_store %arg5[%155, %c0_48], %154 {strides = array<i32>} : memref<64x32xf32, #tpu.memory_space<vmem>>, vector<8x16xf32>,
    %157 = vector.extract_strided_slice %153 {offsets = [0, 16], sizes = [8, 16], strides = [1, 1]} : vector<8x32xf32> to vector<8x16xf32>
    %158 = arith.index_cast %120 : i32 to index
    %c16_49 = arith.constant 16 : index
    %159 = vector.load %arg5[%158, %c16_49] : memref<64x32xf32, #tpu.memory_space<vmem>>, vector<8x16xf32>
    tpu.vector_store %arg5[%158, %c16_49], %157 {strides = array<i32>} : memref<64x32xf32, #tpu.memory_space<vmem>>, vector<8x16xf32>,
    %c3_i32 = arith.constant 3 : i32
    %c8_i32_50 = arith.constant 8 : i32
    %160 = arith.muli %c3_i32, %c8_i32_50 : i32
    %161 = tpu.assume_multiple %160, 8 : i32
    %c7_i32_51 = arith.constant 7 : i32
    %162 = arith.subi %c7_i32_51, %c3_i32 : i32
    %c8_i32_52 = arith.constant 8 : i32
    %163 = arith.muli %162, %c8_i32_52 : i32
    %164 = tpu.assume_multiple %163, 8 : i32
    %165 = arith.index_cast %161 : i32 to index
    %c0_53 = arith.constant 0 : index
    %166 = vector.load %arg7[%165, %c0_53] : memref<64x128xf32, #tpu.memory_space<vmem>>, vector<8x128xf32>
    %167 = arith.index_cast %164 : i32 to index
    %c0_54 = arith.constant 0 : index
    %168 = vector.load %arg7[%167, %c0_54] : memref<64x128xf32, #tpu.memory_space<vmem>>, vector<8x128xf32>
    %169 = arith.select %25, %166, %168 : vector<8x128xi1>, vector<8x128xf32>
    %c0_55 = arith.constant 0 : index
    %c0_56 = arith.constant 0 : index
    %170 = vector.load %arg3[%c0_55, %c0_56] : memref<32x128xf32, #tpu.memory_space<vmem>>, vector<32x128xf32>
    %cst_57 = arith.constant dense<0.000000e+00> : vector<8x128xf32>
    %171 = tpu.matmul %153, %170, %cst_57 {dimension_numbers = #tpu.dot_dimension_numbers<[1], [0], [0], [1], [0, 0, 1, 1], [], []>} : vector<8x32xf32>, vector<32x128xf32>, vector<8x128xf32> -> vector<8x128xf32>
    %172 = arith.addf %169, %171 : vector<8x128xf32>
    %173 = vector.extract_strided_slice %172 {offsets = [0, 0], sizes = [8, 32], strides = [1, 1]} : vector<8x128xf32> to vector<8x32xf32>
    %174 = arith.negf %173 : vector<8x32xf32>
    %175 = math.exp %174 : vector<8x32xf32>
    %cst_58 = arith.constant 1.000000e+00 : f32
    %176 = vector.broadcast %cst_58 : f32 to vector<8x32xf32>
    %177 = arith.addf %176, %175 : vector<8x32xf32>
    %178 = arith.divf %176, %177 : vector<8x32xf32>
    %179 = vector.extract_strided_slice %172 {offsets = [0, 32], sizes = [8, 32], strides = [1, 1]} : vector<8x128xf32> to vector<8x32xf32>
    %180 = arith.negf %179 : vector<8x32xf32>
    %181 = math.exp %180 : vector<8x32xf32>
    %cst_59 = arith.constant 1.000000e+00 : f32
    %182 = vector.broadcast %cst_59 : f32 to vector<8x32xf32>
    %183 = arith.addf %182, %181 : vector<8x32xf32>
    %184 = arith.divf %182, %183 : vector<8x32xf32>
    %185 = vector.extract_strided_slice %172 {offsets = [0, 64], sizes = [8, 32], strides = [1, 1]} : vector<8x128xf32> to vector<8x32xf32>
    %186 = math.tanh %185 : vector<8x32xf32>
    %187 = vector.extract_strided_slice %172 {offsets = [0, 96], sizes = [8, 32], strides = [1, 1]} : vector<8x128xf32> to vector<8x32xf32>
    %188 = arith.negf %187 : vector<8x32xf32>
    %189 = math.exp %188 : vector<8x32xf32>
    %cst_60 = arith.constant 1.000000e+00 : f32
    %190 = vector.broadcast %cst_60 : f32 to vector<8x32xf32>
    %191 = arith.addf %190, %189 : vector<8x32xf32>
    %192 = arith.divf %190, %191 : vector<8x32xf32>
    %193 = arith.mulf %184, %151 : vector<8x32xf32>
    %194 = arith.mulf %178, %186 : vector<8x32xf32>
    %195 = arith.addf %193, %194 : vector<8x32xf32>
    %196 = math.tanh %195 : vector<8x32xf32>
    %197 = arith.mulf %192, %196 : vector<8x32xf32>
    %198 = vector.extract_strided_slice %197 {offsets = [0, 0], sizes = [8, 16], strides = [1, 1]} : vector<8x32xf32> to vector<8x16xf32>
    %199 = arith.index_cast %161 : i32 to index
    %c0_61 = arith.constant 0 : index
    %200 = vector.load %arg5[%199, %c0_61] : memref<64x32xf32, #tpu.memory_space<vmem>>, vector<8x16xf32>
    tpu.vector_store %arg5[%199, %c0_61], %198 {strides = array<i32>} : memref<64x32xf32, #tpu.memory_space<vmem>>, vector<8x16xf32>,
    %201 = vector.extract_strided_slice %197 {offsets = [0, 16], sizes = [8, 16], strides = [1, 1]} : vector<8x32xf32> to vector<8x16xf32>
    %202 = arith.index_cast %164 : i32 to index
    %c16_62 = arith.constant 16 : index
    %203 = vector.load %arg5[%202, %c16_62] : memref<64x32xf32, #tpu.memory_space<vmem>>, vector<8x16xf32>
    tpu.vector_store %arg5[%202, %c16_62], %201 {strides = array<i32>} : memref<64x32xf32, #tpu.memory_space<vmem>>, vector<8x16xf32>,
    %c4_i32 = arith.constant 4 : i32
    %c8_i32_63 = arith.constant 8 : i32
    %204 = arith.muli %c4_i32, %c8_i32_63 : i32
    %205 = tpu.assume_multiple %204, 8 : i32
    %c7_i32_64 = arith.constant 7 : i32
    %206 = arith.subi %c7_i32_64, %c4_i32 : i32
    %c8_i32_65 = arith.constant 8 : i32
    %207 = arith.muli %206, %c8_i32_65 : i32
    %208 = tpu.assume_multiple %207, 8 : i32
    %209 = arith.index_cast %205 : i32 to index
    %c0_66 = arith.constant 0 : index
    %210 = vector.load %arg7[%209, %c0_66] : memref<64x128xf32, #tpu.memory_space<vmem>>, vector<8x128xf32>
    %211 = arith.index_cast %208 : i32 to index
    %c0_67 = arith.constant 0 : index
    %212 = vector.load %arg7[%211, %c0_67] : memref<64x128xf32, #tpu.memory_space<vmem>>, vector<8x128xf32>
    %213 = arith.select %25, %210, %212 : vector<8x128xi1>, vector<8x128xf32>
    %c0_68 = arith.constant 0 : index
    %c0_69 = arith.constant 0 : index
    %214 = vector.load %arg3[%c0_68, %c0_69] : memref<32x128xf32, #tpu.memory_space<vmem>>, vector<32x128xf32>
    %cst_70 = arith.constant dense<0.000000e+00> : vector<8x128xf32>
    %215 = tpu.matmul %197, %214, %cst_70 {dimension_numbers = #tpu.dot_dimension_numbers<[1], [0], [0], [1], [0, 0, 1, 1], [], []>} : vector<8x32xf32>, vector<32x128xf32>, vector<8x128xf32> -> vector<8x128xf32>
    %216 = arith.addf %213, %215 : vector<8x128xf32>
    %217 = vector.extract_strided_slice %216 {offsets = [0, 0], sizes = [8, 32], strides = [1, 1]} : vector<8x128xf32> to vector<8x32xf32>
    %218 = arith.negf %217 : vector<8x32xf32>
    %219 = math.exp %218 : vector<8x32xf32>
    %cst_71 = arith.constant 1.000000e+00 : f32
    %220 = vector.broadcast %cst_71 : f32 to vector<8x32xf32>
    %221 = arith.addf %220, %219 : vector<8x32xf32>
    %222 = arith.divf %220, %221 : vector<8x32xf32>
    %223 = vector.extract_strided_slice %216 {offsets = [0, 32], sizes = [8, 32], strides = [1, 1]} : vector<8x128xf32> to vector<8x32xf32>
    %224 = arith.negf %223 : vector<8x32xf32>
    %225 = math.exp %224 : vector<8x32xf32>
    %cst_72 = arith.constant 1.000000e+00 : f32
    %226 = vector.broadcast %cst_72 : f32 to vector<8x32xf32>
    %227 = arith.addf %226, %225 : vector<8x32xf32>
    %228 = arith.divf %226, %227 : vector<8x32xf32>
    %229 = vector.extract_strided_slice %216 {offsets = [0, 64], sizes = [8, 32], strides = [1, 1]} : vector<8x128xf32> to vector<8x32xf32>
    %230 = math.tanh %229 : vector<8x32xf32>
    %231 = vector.extract_strided_slice %216 {offsets = [0, 96], sizes = [8, 32], strides = [1, 1]} : vector<8x128xf32> to vector<8x32xf32>
    %232 = arith.negf %231 : vector<8x32xf32>
    %233 = math.exp %232 : vector<8x32xf32>
    %cst_73 = arith.constant 1.000000e+00 : f32
    %234 = vector.broadcast %cst_73 : f32 to vector<8x32xf32>
    %235 = arith.addf %234, %233 : vector<8x32xf32>
    %236 = arith.divf %234, %235 : vector<8x32xf32>
    %237 = arith.mulf %228, %195 : vector<8x32xf32>
    %238 = arith.mulf %222, %230 : vector<8x32xf32>
    %239 = arith.addf %237, %238 : vector<8x32xf32>
    %240 = math.tanh %239 : vector<8x32xf32>
    %241 = arith.mulf %236, %240 : vector<8x32xf32>
    %242 = vector.extract_strided_slice %241 {offsets = [0, 0], sizes = [8, 16], strides = [1, 1]} : vector<8x32xf32> to vector<8x16xf32>
    %243 = arith.index_cast %205 : i32 to index
    %c0_74 = arith.constant 0 : index
    %244 = vector.load %arg5[%243, %c0_74] : memref<64x32xf32, #tpu.memory_space<vmem>>, vector<8x16xf32>
    tpu.vector_store %arg5[%243, %c0_74], %242 {strides = array<i32>} : memref<64x32xf32, #tpu.memory_space<vmem>>, vector<8x16xf32>,
    %245 = vector.extract_strided_slice %241 {offsets = [0, 16], sizes = [8, 16], strides = [1, 1]} : vector<8x32xf32> to vector<8x16xf32>
    %246 = arith.index_cast %208 : i32 to index
    %c16_75 = arith.constant 16 : index
    %247 = vector.load %arg5[%246, %c16_75] : memref<64x32xf32, #tpu.memory_space<vmem>>, vector<8x16xf32>
    tpu.vector_store %arg5[%246, %c16_75], %245 {strides = array<i32>} : memref<64x32xf32, #tpu.memory_space<vmem>>, vector<8x16xf32>,
    %c5_i32 = arith.constant 5 : i32
    %c8_i32_76 = arith.constant 8 : i32
    %248 = arith.muli %c5_i32, %c8_i32_76 : i32
    %249 = tpu.assume_multiple %248, 8 : i32
    %c7_i32_77 = arith.constant 7 : i32
    %250 = arith.subi %c7_i32_77, %c5_i32 : i32
    %c8_i32_78 = arith.constant 8 : i32
    %251 = arith.muli %250, %c8_i32_78 : i32
    %252 = tpu.assume_multiple %251, 8 : i32
    %253 = arith.index_cast %249 : i32 to index
    %c0_79 = arith.constant 0 : index
    %254 = vector.load %arg7[%253, %c0_79] : memref<64x128xf32, #tpu.memory_space<vmem>>, vector<8x128xf32>
    %255 = arith.index_cast %252 : i32 to index
    %c0_80 = arith.constant 0 : index
    %256 = vector.load %arg7[%255, %c0_80] : memref<64x128xf32, #tpu.memory_space<vmem>>, vector<8x128xf32>
    %257 = arith.select %25, %254, %256 : vector<8x128xi1>, vector<8x128xf32>
    %c0_81 = arith.constant 0 : index
    %c0_82 = arith.constant 0 : index
    %258 = vector.load %arg3[%c0_81, %c0_82] : memref<32x128xf32, #tpu.memory_space<vmem>>, vector<32x128xf32>
    %cst_83 = arith.constant dense<0.000000e+00> : vector<8x128xf32>
    %259 = tpu.matmul %241, %258, %cst_83 {dimension_numbers = #tpu.dot_dimension_numbers<[1], [0], [0], [1], [0, 0, 1, 1], [], []>} : vector<8x32xf32>, vector<32x128xf32>, vector<8x128xf32> -> vector<8x128xf32>
    %260 = arith.addf %257, %259 : vector<8x128xf32>
    %261 = vector.extract_strided_slice %260 {offsets = [0, 0], sizes = [8, 32], strides = [1, 1]} : vector<8x128xf32> to vector<8x32xf32>
    %262 = arith.negf %261 : vector<8x32xf32>
    %263 = math.exp %262 : vector<8x32xf32>
    %cst_84 = arith.constant 1.000000e+00 : f32
    %264 = vector.broadcast %cst_84 : f32 to vector<8x32xf32>
    %265 = arith.addf %264, %263 : vector<8x32xf32>
    %266 = arith.divf %264, %265 : vector<8x32xf32>
    %267 = vector.extract_strided_slice %260 {offsets = [0, 32], sizes = [8, 32], strides = [1, 1]} : vector<8x128xf32> to vector<8x32xf32>
    %268 = arith.negf %267 : vector<8x32xf32>
    %269 = math.exp %268 : vector<8x32xf32>
    %cst_85 = arith.constant 1.000000e+00 : f32
    %270 = vector.broadcast %cst_85 : f32 to vector<8x32xf32>
    %271 = arith.addf %270, %269 : vector<8x32xf32>
    %272 = arith.divf %270, %271 : vector<8x32xf32>
    %273 = vector.extract_strided_slice %260 {offsets = [0, 64], sizes = [8, 32], strides = [1, 1]} : vector<8x128xf32> to vector<8x32xf32>
    %274 = math.tanh %273 : vector<8x32xf32>
    %275 = vector.extract_strided_slice %260 {offsets = [0, 96], sizes = [8, 32], strides = [1, 1]} : vector<8x128xf32> to vector<8x32xf32>
    %276 = arith.negf %275 : vector<8x32xf32>
    %277 = math.exp %276 : vector<8x32xf32>
    %cst_86 = arith.constant 1.000000e+00 : f32
    %278 = vector.broadcast %cst_86 : f32 to vector<8x32xf32>
    %279 = arith.addf %278, %277 : vector<8x32xf32>
    %280 = arith.divf %278, %279 : vector<8x32xf32>
    %281 = arith.mulf %272, %239 : vector<8x32xf32>
    %282 = arith.mulf %266, %274 : vector<8x32xf32>
    %283 = arith.addf %281, %282 : vector<8x32xf32>
    %284 = math.tanh %283 : vector<8x32xf32>
    %285 = arith.mulf %280, %284 : vector<8x32xf32>
    %286 = vector.extract_strided_slice %285 {offsets = [0, 0], sizes = [8, 16], strides = [1, 1]} : vector<8x32xf32> to vector<8x16xf32>
    %287 = arith.index_cast %249 : i32 to index
    %c0_87 = arith.constant 0 : index
    %288 = vector.load %arg5[%287, %c0_87] : memref<64x32xf32, #tpu.memory_space<vmem>>, vector<8x16xf32>
    tpu.vector_store %arg5[%287, %c0_87], %286 {strides = array<i32>} : memref<64x32xf32, #tpu.memory_space<vmem>>, vector<8x16xf32>,
    %289 = vector.extract_strided_slice %285 {offsets = [0, 16], sizes = [8, 16], strides = [1, 1]} : vector<8x32xf32> to vector<8x16xf32>
    %290 = arith.index_cast %252 : i32 to index
    %c16_88 = arith.constant 16 : index
    %291 = vector.load %arg5[%290, %c16_88] : memref<64x32xf32, #tpu.memory_space<vmem>>, vector<8x16xf32>
    tpu.vector_store %arg5[%290, %c16_88], %289 {strides = array<i32>} : memref<64x32xf32, #tpu.memory_space<vmem>>, vector<8x16xf32>,
    %c6_i32 = arith.constant 6 : i32
    %c8_i32_89 = arith.constant 8 : i32
    %292 = arith.muli %c6_i32, %c8_i32_89 : i32
    %293 = tpu.assume_multiple %292, 8 : i32
    %c7_i32_90 = arith.constant 7 : i32
    %294 = arith.subi %c7_i32_90, %c6_i32 : i32
    %c8_i32_91 = arith.constant 8 : i32
    %295 = arith.muli %294, %c8_i32_91 : i32
    %296 = tpu.assume_multiple %295, 8 : i32
    %297 = arith.index_cast %293 : i32 to index
    %c0_92 = arith.constant 0 : index
    %298 = vector.load %arg7[%297, %c0_92] : memref<64x128xf32, #tpu.memory_space<vmem>>, vector<8x128xf32>
    %299 = arith.index_cast %296 : i32 to index
    %c0_93 = arith.constant 0 : index
    %300 = vector.load %arg7[%299, %c0_93] : memref<64x128xf32, #tpu.memory_space<vmem>>, vector<8x128xf32>
    %301 = arith.select %25, %298, %300 : vector<8x128xi1>, vector<8x128xf32>
    %c0_94 = arith.constant 0 : index
    %c0_95 = arith.constant 0 : index
    %302 = vector.load %arg3[%c0_94, %c0_95] : memref<32x128xf32, #tpu.memory_space<vmem>>, vector<32x128xf32>
    %cst_96 = arith.constant dense<0.000000e+00> : vector<8x128xf32>
    %303 = tpu.matmul %285, %302, %cst_96 {dimension_numbers = #tpu.dot_dimension_numbers<[1], [0], [0], [1], [0, 0, 1, 1], [], []>} : vector<8x32xf32>, vector<32x128xf32>, vector<8x128xf32> -> vector<8x128xf32>
    %304 = arith.addf %301, %303 : vector<8x128xf32>
    %305 = vector.extract_strided_slice %304 {offsets = [0, 0], sizes = [8, 32], strides = [1, 1]} : vector<8x128xf32> to vector<8x32xf32>
    %306 = arith.negf %305 : vector<8x32xf32>
    %307 = math.exp %306 : vector<8x32xf32>
    %cst_97 = arith.constant 1.000000e+00 : f32
    %308 = vector.broadcast %cst_97 : f32 to vector<8x32xf32>
    %309 = arith.addf %308, %307 : vector<8x32xf32>
    %310 = arith.divf %308, %309 : vector<8x32xf32>
    %311 = vector.extract_strided_slice %304 {offsets = [0, 32], sizes = [8, 32], strides = [1, 1]} : vector<8x128xf32> to vector<8x32xf32>
    %312 = arith.negf %311 : vector<8x32xf32>
    %313 = math.exp %312 : vector<8x32xf32>
    %cst_98 = arith.constant 1.000000e+00 : f32
    %314 = vector.broadcast %cst_98 : f32 to vector<8x32xf32>
    %315 = arith.addf %314, %313 : vector<8x32xf32>
    %316 = arith.divf %314, %315 : vector<8x32xf32>
    %317 = vector.extract_strided_slice %304 {offsets = [0, 64], sizes = [8, 32], strides = [1, 1]} : vector<8x128xf32> to vector<8x32xf32>
    %318 = math.tanh %317 : vector<8x32xf32>
    %319 = vector.extract_strided_slice %304 {offsets = [0, 96], sizes = [8, 32], strides = [1, 1]} : vector<8x128xf32> to vector<8x32xf32>
    %320 = arith.negf %319 : vector<8x32xf32>
    %321 = math.exp %320 : vector<8x32xf32>
    %cst_99 = arith.constant 1.000000e+00 : f32
    %322 = vector.broadcast %cst_99 : f32 to vector<8x32xf32>
    %323 = arith.addf %322, %321 : vector<8x32xf32>
    %324 = arith.divf %322, %323 : vector<8x32xf32>
    %325 = arith.mulf %316, %283 : vector<8x32xf32>
    %326 = arith.mulf %310, %318 : vector<8x32xf32>
    %327 = arith.addf %325, %326 : vector<8x32xf32>
    %328 = math.tanh %327 : vector<8x32xf32>
    %329 = arith.mulf %324, %328 : vector<8x32xf32>
    %330 = vector.extract_strided_slice %329 {offsets = [0, 0], sizes = [8, 16], strides = [1, 1]} : vector<8x32xf32> to vector<8x16xf32>
    %331 = arith.index_cast %293 : i32 to index
    %c0_100 = arith.constant 0 : index
    %332 = vector.load %arg5[%331, %c0_100] : memref<64x32xf32, #tpu.memory_space<vmem>>, vector<8x16xf32>
    tpu.vector_store %arg5[%331, %c0_100], %330 {strides = array<i32>} : memref<64x32xf32, #tpu.memory_space<vmem>>, vector<8x16xf32>,
    %333 = vector.extract_strided_slice %329 {offsets = [0, 16], sizes = [8, 16], strides = [1, 1]} : vector<8x32xf32> to vector<8x16xf32>
    %334 = arith.index_cast %296 : i32 to index
    %c16_101 = arith.constant 16 : index
    %335 = vector.load %arg5[%334, %c16_101] : memref<64x32xf32, #tpu.memory_space<vmem>>, vector<8x16xf32>
    tpu.vector_store %arg5[%334, %c16_101], %333 {strides = array<i32>} : memref<64x32xf32, #tpu.memory_space<vmem>>, vector<8x16xf32>,
    %c7_i32_102 = arith.constant 7 : i32
    %c8_i32_103 = arith.constant 8 : i32
    %336 = arith.muli %c7_i32_102, %c8_i32_103 : i32
    %337 = tpu.assume_multiple %336, 8 : i32
    %c7_i32_104 = arith.constant 7 : i32
    %338 = arith.subi %c7_i32_104, %c7_i32_102 : i32
    %c8_i32_105 = arith.constant 8 : i32
    %339 = arith.muli %338, %c8_i32_105 : i32
    %340 = tpu.assume_multiple %339, 8 : i32
    %341 = arith.index_cast %337 : i32 to index
    %c0_106 = arith.constant 0 : index
    %342 = vector.load %arg7[%341, %c0_106] : memref<64x128xf32, #tpu.memory_space<vmem>>, vector<8x128xf32>
    %343 = arith.index_cast %340 : i32 to index
    %c0_107 = arith.constant 0 : index
    %344 = vector.load %arg7[%343, %c0_107] : memref<64x128xf32, #tpu.memory_space<vmem>>, vector<8x128xf32>
    %345 = arith.select %25, %342, %344 : vector<8x128xi1>, vector<8x128xf32>
    %c0_108 = arith.constant 0 : index
    %c0_109 = arith.constant 0 : index
    %346 = vector.load %arg3[%c0_108, %c0_109] : memref<32x128xf32, #tpu.memory_space<vmem>>, vector<32x128xf32>
    %cst_110 = arith.constant dense<0.000000e+00> : vector<8x128xf32>
    %347 = tpu.matmul %329, %346, %cst_110 {dimension_numbers = #tpu.dot_dimension_numbers<[1], [0], [0], [1], [0, 0, 1, 1], [], []>} : vector<8x32xf32>, vector<32x128xf32>, vector<8x128xf32> -> vector<8x128xf32>
    %348 = arith.addf %345, %347 : vector<8x128xf32>
    %349 = vector.extract_strided_slice %348 {offsets = [0, 0], sizes = [8, 32], strides = [1, 1]} : vector<8x128xf32> to vector<8x32xf32>
    %350 = arith.negf %349 : vector<8x32xf32>
    %351 = math.exp %350 : vector<8x32xf32>
    %cst_111 = arith.constant 1.000000e+00 : f32
    %352 = vector.broadcast %cst_111 : f32 to vector<8x32xf32>
    %353 = arith.addf %352, %351 : vector<8x32xf32>
    %354 = arith.divf %352, %353 : vector<8x32xf32>
    %355 = vector.extract_strided_slice %348 {offsets = [0, 32], sizes = [8, 32], strides = [1, 1]} : vector<8x128xf32> to vector<8x32xf32>
    %356 = arith.negf %355 : vector<8x32xf32>
    %357 = math.exp %356 : vector<8x32xf32>
    %cst_112 = arith.constant 1.000000e+00 : f32
    %358 = vector.broadcast %cst_112 : f32 to vector<8x32xf32>
    %359 = arith.addf %358, %357 : vector<8x32xf32>
    %360 = arith.divf %358, %359 : vector<8x32xf32>
    %361 = vector.extract_strided_slice %348 {offsets = [0, 64], sizes = [8, 32], strides = [1, 1]} : vector<8x128xf32> to vector<8x32xf32>
    %362 = math.tanh %361 : vector<8x32xf32>
    %363 = vector.extract_strided_slice %348 {offsets = [0, 96], sizes = [8, 32], strides = [1, 1]} : vector<8x128xf32> to vector<8x32xf32>
    %364 = arith.negf %363 : vector<8x32xf32>
    %365 = math.exp %364 : vector<8x32xf32>
    %cst_113 = arith.constant 1.000000e+00 : f32
    %366 = vector.broadcast %cst_113 : f32 to vector<8x32xf32>
    %367 = arith.addf %366, %365 : vector<8x32xf32>
    %368 = arith.divf %366, %367 : vector<8x32xf32>
    %369 = arith.mulf %360, %327 : vector<8x32xf32>
    %370 = arith.mulf %354, %362 : vector<8x32xf32>
    %371 = arith.addf %369, %370 : vector<8x32xf32>
    %372 = math.tanh %371 : vector<8x32xf32>
    %373 = arith.mulf %368, %372 : vector<8x32xf32>
    %374 = vector.extract_strided_slice %373 {offsets = [0, 0], sizes = [8, 16], strides = [1, 1]} : vector<8x32xf32> to vector<8x16xf32>
    %375 = arith.index_cast %337 : i32 to index
    %c0_114 = arith.constant 0 : index
    %376 = vector.load %arg5[%375, %c0_114] : memref<64x32xf32, #tpu.memory_space<vmem>>, vector<8x16xf32>
    tpu.vector_store %arg5[%375, %c0_114], %374 {strides = array<i32>} : memref<64x32xf32, #tpu.memory_space<vmem>>, vector<8x16xf32>,
    %377 = vector.extract_strided_slice %373 {offsets = [0, 16], sizes = [8, 16], strides = [1, 1]} : vector<8x32xf32> to vector<8x16xf32>
    %378 = arith.index_cast %340 : i32 to index
    %c16_115 = arith.constant 16 : index
    %379 = vector.load %arg5[%378, %c16_115] : memref<64x32xf32, #tpu.memory_space<vmem>>, vector<8x16xf32>
    tpu.vector_store %arg5[%378, %c16_115], %377 {strides = array<i32>} : memref<64x32xf32, #tpu.memory_space<vmem>>, vector<8x16xf32>,
    %c8_i32_116 = arith.constant 8 : i32
    %c0_117 = arith.constant 0 : index
    %c0_118 = arith.constant 0 : index
    %380 = vector.load %arg6[%c0_117, %c0_118] : memref<8x32xf32, #tpu.memory_space<vmem>>, vector<8x32xf32>
    tpu.vector_store %arg6[%c0_117, %c0_118], %373 {strides = array<i32>} : memref<8x32xf32, #tpu.memory_space<vmem>>, vector<8x32xf32>,
    return
  }
  func.func @transform_0(%arg0: i32) -> (i32, i32) {
    %c0_i32 = arith.constant 0 : i32
    %c0_i32_0 = arith.constant 0 : i32
    %c0_i32_1 = arith.constant 0 : i32
    return %c0_i32, %c0_i32_0 : i32, i32
  }
  func.func @transform_1(%arg0: i32) -> (i32, i32) {
    %c0_i32 = arith.constant 0 : i32
    %c0_i32_0 = arith.constant 0 : i32
    %c0_i32_1 = arith.constant 0 : i32
    return %c0_i32, %c0_i32_0 : i32, i32
  }
  func.func @transform_2(%arg0: i32) -> (i32, i32) {
    %c0_i32 = arith.constant 0 : i32
    %c0_i32_0 = arith.constant 0 : i32
    %c0_i32_1 = arith.constant 0 : i32
    return %c0_i32, %c0_i32_0 : i32, i32
  }
  func.func @transform_3(%arg0: i32) -> (i32, i32) {
    %c0_i32 = arith.constant 0 : i32
    %c0_i32_0 = arith.constant 0 : i32
    %c0_i32_1 = arith.constant 0 : i32
    return %c0_i32, %c0_i32_0 : i32, i32
  }
  func.func @transform_4(%arg0: i32) -> (i32, i32) {
    %c0_i32 = arith.constant 0 : i32
    %c0_i32_0 = arith.constant 0 : i32
    %c0_i32_1 = arith.constant 0 : i32
    return %c0_i32, %c0_i32_0 : i32, i32
  }
  func.func @transform_5(%arg0: i32) -> (i32, i32) {
    %c0_i32 = arith.constant 0 : i32
    %c0_i32_0 = arith.constant 0 : i32
    %c0_i32_1 = arith.constant 0 : i32
    return %c0_i32, %c0_i32_0 : i32, i32
  }
}

</mosaic_0001>

<bundles_post_ra>
// kernel: tpu_custom_call.1
= control target key start
LH: loop header
LB: loop body
LE: loop exit
PB: predicated region body
PF: predicated region fallthrough
CT: control target
= control target key end

     0   :  { %vm39_vm0 = vcmask 261120   ;;  %v1456_v6 = vmov 0.0|0.0   ;;  %vm1457_vm1 = vmmov 0   ;;  %v1458_v8 = vmov 0.0   ;;  %s1802_s0 = inlined_call_operand.vmem [shape: f32[64,32], index: 0, kind: input, shape index: {}]   ;;  %s1803_s1 = inlined_call_operand.vmem [shape: f32[32,128], index: 1, kind: input, shape index: {}]   ;;  %s1804_s2 = inlined_call_operand.vmem [shape: f32[32,128], index: 2, kind: input, shape index: {}]   ;;  %s1805_s3 = inlined_call_operand.vmem [shape: f32[1,128], index: 3, kind: input, shape index: {}]   ;;  %s1806_s4 = inlined_call_operand.vmem [shape: f32[64,32], index: 4, kind: output, shape index: {0}]   ;;  %s1807_s5 = inlined_call_operand.hbm [shape: f32[8,32], index: 5, kind: output, shape index: {1}]  }
   0x1   :  { %v28_v0 = vld [vmem:[%s1803_s1] sm:$0xff]  ;;  %v29_v1 = vld [vmem:[%s1803_s1 + $0x8] sm:$0xff]  ;;  %v30_v2 = vld [vmem:[%s1803_s1 + $0x10] sm:$0xff]  ;;  %1314 = vmatprep.subr.bf16.mxu1 %v1456_v6  ;;  %1226 = vmatprep.mubr.msk.f32.mxu1 %vm1457_vm1, %v1458_v8 }
   0x2   :  { %v1306_v3 = vpack.c.bf16 %v29_v1, %v28_v0  ;;  %v31_v4 = vld [vmem:[%s1803_s1 + $0x18] sm:$0xff]  ;;  %v20_v5 = vld [vmem:[%s1802_s0] sm:$0xff]  ;;  %v197_v10 = vld [vmem:[%s1804_s2 + $0x8] sm:$0xff] }
   0x3   :  { %v1310_v7 = vpack.c.bf16 %v31_v4, %v30_v2  ;;  %1206 = vmatprep.mubr.msk.f32.mxu0 %vm39_vm0, %v20_v5  ;;  %v196_v9 = vld [vmem:[%s1804_s2] sm:$0xff]  ;;  %v198_v12 = vld [vmem:[%s1804_s2 + $0x10] sm:$0xff]  ;;  %v199_v13 = vld [vmem:[%s1804_s2 + $0x18] sm:$0xff] }
   0x4   :  { %1307 = vmatprep.subr.bf16.mxu0 %v1306_v3  ;;  %v1517_v11 = vpack.c.bf16 %v197_v10, %v196_v9 }
   0x5   :  { %1309 = vmatpush3.bf16.msra.mxu0 %v1306_v3 }
   0x6   :  { %1311 = vmatprep.subr.bf16.mxu0 %v1310_v7 }
   0x7   :  { %11 = vsyncpa [#allocation4], 0  ;;  %1316 = vmatpush3.bf16.msra.mxu1 %v1517_v11  ;;  %v1526_v14 = vpack.c.bf16 %v199_v13, %v198_v12  ;;  %v21_v15 = vld [vmem:[%s1802_s0 + $0x8] sm:$0xff]  ;;  %v22_v16 = vld [vmem:[%s1802_s0 + $0x10] sm:$0xff]  ;;  %v177_v22 = vlaneseq  ;;  %vm302_vm3 = vcmask 130048   ;;  %vm305_vm4 = vcmask 261248  }
   0x8   :  { %1317 = vmatprep.subr.bf16.mxu1 %v1456_v6  ;;  %v23_v17 = vld [vmem:[%s1802_s0 + $0x18] sm:$0xff]  ;;  %v24_v18 = vld [vmem:[%s1802_s0 + $0x20] sm:$0xff]  ;;  %v25_v19 = vld [vmem:[%s1802_s0 + $0x28] sm:$0xff]  ;;  %s1461_s26 = smov [#allocation3]  }
   0x9   :  { %1313 = vmatpush3.bf16.msra.mxu0 %v1310_v7  ;;  %v26_v20 = vld [vmem:[%s1802_s0 + $0x30] sm:$0xff]  ;;  %v27_v21 = vld [vmem:[%s1802_s0 + $0x38] sm:$0xff]  ;;  %v1108_v23 = vld [vmem:[%s1805_s3] ss:$0 sm:$0xff]  ;;  %v178_v25 = vand.u32 127, %v177_v22  ;;  %s1459_s0 = smov 64  }
   0xa   :  { %1326 = vmatprep.subr.bf16.mxu0 %v1456_v6  ;;  %s1460_s3 = smov 32   ;;  %s1098_s27 = sshll.u32 %s1461_s26, 4  ;;  %s1099_s27 = int_to_ptr.vmem [resolvable:$true] %s1098_s27 }
   0xb   :  { %1319 = vmatpush3.bf16.msra.mxu1 %v1526_v14  ;;  %v183_v31 = vand.u32 31, %v178_v25  ;;  %p1437_p1 = scmp.lt.s32.totalorder %s1099_s27, %s1099_s27 }
   0xc   :  { %1207 = vmatmul.mubr.msk.f32.vlgmr.msra.gmra.mrb[0].mxu0 %vm39_vm0, %v21_v15  ;;  %1320 = vmatprep.subr.bf16.mxu1 %v1456_v6 }
   0xd   :  { %1209 = vmatprep.mubr.msk.f32.mxu0 %vm39_vm0, %v22_v16  ;;  %1328 = vmatpush3.bf16.msra.mxu0 %v1517_v11  ;;  %vm1582_vm2 = vcmp.lt.s32.totalorder %v183_v31, 16 }
   0xe   :  { %1227 = vmatmul.mubr.f32.vlgmr.msra.gmra.mrb[0].mxu1 %v1458_v8  ;;  %1329 = vmatprep.subr.bf16.mxu0 %v1456_v6 }
   0xf   :  { %1322 = vmatpush3.bf16.msra.mxu1 %v1517_v11  ;;  %1237 = vmatprep.mubr.msk.f32.mxu1 %vm1457_vm1, %v1458_v8 }
  0x10   :  { %1210 = vmatmul.mubr.msk.f32.gmra.mrb[2].mxu0 %vm39_vm0, %v23_v17  ;;  %1323 = vmatprep.subr.bf16.mxu1 %v1456_v6 }
  0x11   :  { %1212 = vmatprep.mubr.msk.f32.mxu0 %vm39_vm0, %v24_v18  ;;  %1331 = vmatpush3.bf16.msra.mxu0 %v1526_v14 }
  0x12   :  { %1338 = vmatprep.subr.bf16.mxu0 %v1456_v6 }
  0x13   :  { %1325 = vmatpush3.bf16.msra.mxu1 %v1526_v14 }
  0x14   :  { %1213 = vmatmul.mubr.msk.f32.gmra.mrb[4].mxu0 %vm39_vm0, %v25_v19  ;;  %1332 = vmatprep.subr.bf16.mxu1 %v1456_v6 }
  0x15   :  { %1215 = vmatprep.mubr.msk.f32.mxu0 %vm39_vm0, %v26_v20 }
  0x18   :  { %1216 = vmatmul.mubr.msk.f32.gmra.mrb[6].mxu0 %vm39_vm0, %v27_v21 }
  0x19   :  { %1248 = vmatprep.mubr.msk.f32.mxu0 %vm1457_vm1, %v1458_v8 }
  0xdf   :  { %v1208_v24 = vpop.f32.mrb[0].mxu0 }
  0xe0   :  { %v1576_v26 = vadd.f32 %v1208_v24, %v1108_v23  ;;  %v130_v27 = vpop.f32.mrb[1].mxu0 }
  0xe1   :  { %v269_v28 = vpop.f32.mrb[0].mxu1  ;;  %v1606_v45 = vadd.f32 %v1108_v23, %v130_v27 }
  0xe2   :  { %v1228_v29 = vpop.f32.mrb[1].mxu1 }
  0xe3   :  { %v1211_v30 = vpop.f32.mrb[2].mxu0 }
  0xe4   :  { %v1578_v32 = vadd.f32 %v1211_v30, %v1108_v23  ;;  %v140_v33 = vpop.f32.mrb[3].mxu0 }
  0xe5   :  { %v1580_v34 = vadd.f32 %v1108_v23, %v140_v33 }
  0xe7   :  { %v1214_v35 = vpop.f32.mrb[4].mxu0 }
  0xe8   :  { %v1586_v37 = vadd.f32 %v1214_v35, %v1108_v23  ;;  %v150_v38 = vpop.f32.mrb[5].mxu0 }
  0xe9   :  { %v1588_v39 = vadd.f32 %v1108_v23, %v150_v38 }
  0xea   :  { %v425_v40 = vsel %vm1582_vm2, %v1580_v34, %v1586_v37  ;;  %v761_v41 = vsel %vm1582_vm2, %v1586_v37, %v1580_v34 }
  0xeb   :  { %v1217_v42 = vpop.f32.mrb[6].mxu0  ;;  %v539_v43 = vsel %vm1582_vm2, %v1578_v32, %v1588_v39  ;;  %v651_v44 = vsel %vm1582_vm2, %v1588_v39, %v1578_v32 }
  0xec   :  { %v1608_v46 = vadd.f32 %v1217_v42, %v1108_v23  ;;  %v160_v47 = vpop.f32.mrb[7].mxu0 }
  0xed   :  { %v1610_v48 = vadd.f32 %v1108_v23, %v160_v47 }
  0xee   :  { %v195_v49 = vsel %vm1582_vm2, %v1606_v45, %v1608_v46  ;;  %v981_v50 = vsel %vm1582_vm2, %v1608_v46, %v1606_v45 }
  0xef   :  { %v273_v51 = vadd.f32 %v269_v28, %v195_v49  ;;  %v311_v52 = vsel %vm1582_vm2, %v1576_v26, %v1610_v48  ;;  %v871_v53 = vsel %vm1582_vm2, %v1610_v48, %v1576_v26 }
  0xf1   :  { %1368 = vtanh.f32 %v273_v51  ;;  %v1117_v55 = vmul.f32 -1.442695, %v273_v51 }
  0xf3   :  { %1370 = vpow2.f32 %v1117_v55 }
  0xfb   :  { %v1369_v54 = vpop.eup %1368 }
  0xfc   :  { %283 = vrot.lane.b32.xlu0 %v1369_v54, %s1459_s0 }
  0xfd   :  { %v1371_v56 = vpop.eup %1370 }
  0xfe   :  { %v277_v57 = vadd.f32 1.0, %v1371_v56 }
 0x100   :  { %1372 = vrcp.f32 %v277_v57 }
 0x10a   :  { %v1373_v58 = vpop.eup %1372 }
 0x10b   :  { %v281_v61 = vmul.f32 0.0, %v1373_v58 }
 0x16e   :  { %v284_v59 = vpop.permute.xlu0 %283 }
 0x16f   :  { %v286_v60 = vmul.f32 %v1373_v58, %v284_v59 }
 0x171   :  { %288 = vrot.lane.b32.xlu0 %v286_v60, %s1460_s3 }
 0x1e3   :  { %v289_v62 = vpop.permute.xlu0 %288 }
 0x1e4   :  { %v291_v63 = vadd.f32 %v289_v62, %v281_v61 }
 0x1e6   :  { %1374 = vtanh.f32 %v291_v63 }
 0x1f0   :  { %v1375_v0 = vpop.eup %1374 }
 0x1f1   :  { %294 = vrot.lane.b32.xlu1 %v1375_v0, %s1459_s0 }
 0x263   :  { %v295_v1 = vpop.permute.xlu1 %294 }
 0x264   :  { %v297_v2 = vmul.f32 %v1373_v58, %v295_v1 }
 0x266   :  { %299 = vrot.lane.b32.xlu1 %v297_v2, %s1460_s3 }
 0x2d8   :  { %v300_v3 = vpop.permute.xlu1 %299 }
 0x2d9   :  { %303 = vst.msk [vmem:[%s1806_s4] sm:$0xff] %vm302_vm3, %v300_v3  ;;  %1238 = vmatmul.mubr.msk.f32.vlgmr.msra.gmra.mrb[2].mxu1 %vm39_vm0, %v300_v3 }
 0x2da   :  { %1118 = vst.msk [vmem:[%s1806_s4 + $0x38] sm:$0xff] %vm305_vm4, %v300_v3  ;;  %1334 = vmatpush3.bf16.msra.mxu1 %v1517_v11  ;;  %1259 = vmatprep.mubr.msk.f32.mxu1 %vm1457_vm1, %v1458_v8 }
 0x2db   :  { %1335 = vmatprep.subr.bf16.mxu1 %v1456_v6 }
 0x2de   :  { %1337 = vmatpush3.bf16.msra.mxu1 %v1526_v14 }
 0x2df   :  { %1344 = vmatprep.subr.bf16.mxu1 %v1456_v6 }
 0x3ac   :  { %v384_v4 = vpop.f32.mrb[2].mxu1 }
 0x3ad   :  { %v388_v5 = vadd.f32 %v384_v4, %v311_v52  ;;  %v1239_v7 = vpop.f32.mrb[3].mxu1 }
 0x3af   :  { %1376 = vtanh.f32 %v388_v5  ;;  %v1120_v10 = vmul.f32 -1.442695, %v388_v5 }
 0x3b1   :  { %1378 = vpow2.f32 %v1120_v10 }
 0x3b9   :  { %v1377_v9 = vpop.eup %1376 }
 0x3ba   :  { %398 = vrot.lane.b32.xlu0 %v1377_v9, %s1459_s0 }
 0x3bb   :  { %v1379_v12 = vpop.eup %1378 }
 0x3bc   :  { %v392_v13 = vadd.f32 1.0, %v1379_v12 }
 0x3be   :  { %1380 = vrcp.f32 %v392_v13 }
 0x3c8   :  { %v1381_v15 = vpop.eup %1380 }
 0x3c9   :  { %v396_v18 = vmul.f32 %v1381_v15, %v291_v63 }
 0x42c   :  { %v399_v16 = vpop.permute.xlu0 %398 }
 0x42d   :  { %v401_v17 = vmul.f32 %v1381_v15, %v399_v16 }
 0x42f   :  { %403 = vrot.lane.b32.xlu1 %v401_v17, %s1460_s3 }
 0x4a1   :  { %v404_v19 = vpop.permute.xlu1 %403 }
 0x4a2   :  { %v406_v20 = vadd.f32 %v404_v19, %v396_v18 }
 0x4a4   :  { %1382 = vtanh.f32 %v406_v20 }
 0x4ae   :  { %v1383_v21 = vpop.eup %1382 }
 0x4af   :  { %409 = vrot.lane.b32.xlu0 %v1383_v21, %s1459_s0 }
 0x521   :  { %v410_v22 = vpop.permute.xlu0 %409 }
 0x522   :  { %v412_v23 = vmul.f32 %v1381_v15, %v410_v22 }
 0x524   :  { %414 = vrot.lane.b32.xlu1 %v412_v23, %s1460_s3 }
 0x596   :  { %v415_v24 = vpop.permute.xlu1 %414 }
 0x597   :  { %1121 = vst.msk [vmem:[%s1806_s4 + $0x8] sm:$0xff] %vm302_vm3, %v415_v24  ;;  %1249 = vmatmul.mubr.msk.f32.vlgmr.msra.gmra.mrb[8].mxu0 %vm39_vm0, %v415_v24 }
 0x598   :  { %1122 = vst.msk [vmem:[%s1806_s4 + $0x30] sm:$0xff] %vm305_vm4, %v415_v24  ;;  %1340 = vmatpush3.bf16.msra.mxu0 %v1517_v11  ;;  %1270 = vmatprep.mubr.msk.f32.mxu0 %vm1457_vm1, %v1458_v8 }
 0x599   :  { %1341 = vmatprep.subr.bf16.mxu0 %v1456_v6 }
 0x59c   :  { %1343 = vmatpush3.bf16.msra.mxu0 %v1526_v14 }
 0x59d   :  { %1350 = vmatprep.subr.bf16.mxu0 %v1456_v6 }
 0x66a   :  { %v498_v25 = vpop.f32.mrb[8].mxu0 }
 0x66b   :  { %v502_v27 = vadd.f32 %v498_v25, %v425_v40  ;;  %v1250_v28 = vpop.f32.mrb[9].mxu0 }
 0x66d   :  { %1384 = vtanh.f32 %v502_v27  ;;  %v1124_v30 = vmul.f32 -1.442695, %v502_v27 }
 0x66f   :  { %1386 = vpow2.f32 %v1124_v30 }
 0x677   :  { %v1385_v29 = vpop.eup %1384 }
 0x678   :  { %512 = vrot.lane.b32.xlu0 %v1385_v29, %s1459_s0 }
 0x679   :  { %v1387_v31 = vpop.eup %1386 }
 0x67a   :  { %v506_v33 = vadd.f32 1.0, %v1387_v31 }
 0x67c   :  { %1388 = vrcp.f32 %v506_v33 }
 0x686   :  { %v1389_v35 = vpop.eup %1388 }
 0x687   :  { %v510_v47 = vmul.f32 %v1389_v35, %v406_v20 }
 0x6ea   :  { %v513_v38 = vpop.permute.xlu0 %512 }
 0x6eb   :  { %v515_v42 = vmul.f32 %v1389_v35, %v513_v38 }
 0x6ed   :  { %517 = vrot.lane.b32.xlu1 %v515_v42, %s1460_s3 }
 0x75f   :  { %v518_v49 = vpop.permute.xlu1 %517 }
 0x760   :  { %v520_v51 = vadd.f32 %v518_v49, %v510_v47 }
 0x762   :  { %1390 = vtanh.f32 %v520_v51 }
 0x76c   :  { %v1391_v40 = vpop.eup %1390 }
 0x76d   :  { %523 = vrot.lane.b32.xlu0 %v1391_v40, %s1459_s0 }
 0x7df   :  { %v524_v52 = vpop.permute.xlu0 %523 }
 0x7e0   :  { %v526_v54 = vmul.f32 %v1389_v35, %v524_v52 }
 0x7e2   :  { %528 = vrot.lane.b32.xlu1 %v526_v54, %s1460_s3 }
 0x854   :  { %v529_v55 = vpop.permute.xlu1 %528 }
 0x855   :  { %1125 = vst.msk [vmem:[%s1806_s4 + $0x10] sm:$0xff] %vm302_vm3, %v529_v55  ;;  %1260 = vmatmul.mubr.msk.f32.vlgmr.msra.gmra.mrb[4].mxu1 %vm39_vm0, %v529_v55 }
 0x856   :  { %1126 = vst.msk [vmem:[%s1806_s4 + $0x28] sm:$0xff] %vm305_vm4, %v529_v55  ;;  %1346 = vmatpush3.bf16.msra.mxu1 %v1517_v11  ;;  %1281 = vmatprep.mubr.msk.f32.mxu1 %vm1457_vm1, %v1458_v8 }
 0x857   :  { %1347 = vmatprep.subr.bf16.mxu1 %v1456_v6 }
 0x85a   :  { %1349 = vmatpush3.bf16.msra.mxu1 %v1526_v14 }
 0x85b   :  { %1356 = vmatprep.subr.bf16.mxu1 %v1456_v6 }
 0x928   :  { %v612_v56 = vpop.f32.mrb[4].mxu1 }
 0x929   :  { %v616_v57 = vadd.f32 %v612_v56, %v539_v43  ;;  %v1261_v58 = vpop.f32.mrb[5].mxu1 }
 0x92b   :  { %1392 = vtanh.f32 %v616_v57  ;;  %v1128_v60 = vmul.f32 -1.442695, %v616_v57 }
 0x92d   :  { %1394 = vpow2.f32 %v1128_v60 }
 0x935   :  { %v1393_v59 = vpop.eup %1392 }
 0x936   :  { %626 = vrot.lane.b32.xlu0 %v1393_v59, %s1459_s0 }
 0x937   :  { %v1395_v61 = vpop.eup %1394 }
 0x938   :  { %v620_v62 = vadd.f32 1.0, %v1395_v61 }
 0x93a   :  { %1396 = vrcp.f32 %v620_v62 }
 0x944   :  { %v1397_v63 = vpop.eup %1396 }
 0x945   :  { %v624_v2 = vmul.f32 %v1397_v63, %v520_v51 }
 0x9a8   :  { %v627_v0 = vpop.permute.xlu0 %626 }
 0x9a9   :  { %v629_v1 = vmul.f32 %v1397_v63, %v627_v0 }
 0x9ab   :  { %631 = vrot.lane.b32.xlu1 %v629_v1, %s1460_s3 }
 0xa1d   :  { %v632_v3 = vpop.permute.xlu1 %631 }
 0xa1e   :  { %v634_v4 = vadd.f32 %v632_v3, %v624_v2 }
 0xa20   :  { %1398 = vtanh.f32 %v634_v4 }
 0xa2a   :  { %v1399_v43 = vpop.eup %1398 }
 0xa2b   :  { %637 = vrot.lane.b32.xlu0 %v1399_v43, %s1459_s0 }
 0xa9d   :  { %v638_v5 = vpop.permute.xlu0 %637 }
 0xa9e   :  { %v640_v7 = vmul.f32 %v1397_v63, %v638_v5 }
 0xaa0   :  { %642 = vrot.lane.b32.xlu1 %v640_v7, %s1460_s3 }
 0xb12   :  { %v643_v9 = vpop.permute.xlu1 %642 }
 0xb13   :  { %1129 = vst.msk [vmem:[%s1806_s4 + $0x18] sm:$0xff] %vm302_vm3, %v643_v9  ;;  %1271 = vmatmul.mubr.msk.f32.vlgmr.msra.gmra.mrb[10].mxu0 %vm39_vm0, %v643_v9 }
 0xb14   :  { %1130 = vst.msk [vmem:[%s1806_s4 + $0x20] sm:$0xff] %vm305_vm4, %v643_v9  ;;  %1352 = vmatpush3.bf16.msra.mxu0 %v1517_v11  ;;  %1292 = vmatprep.mubr.msk.f32.mxu0 %vm1457_vm1, %v1458_v8 }
 0xb15   :  { %1353 = vmatprep.subr.bf16.mxu0 %v1456_v6 }
 0xb18   :  { %1355 = vmatpush3.bf16.msra.mxu0 %v1526_v14 }
 0xbe6   :  { %v724_v10 = vpop.f32.mrb[10].mxu0 }
 0xbe7   :  { %v728_v12 = vadd.f32 %v724_v10, %v651_v44  ;;  %v1272_v13 = vpop.f32.mrb[11].mxu0 }
 0xbe9   :  { %1400 = vtanh.f32 %v728_v12  ;;  %v1132_v16 = vmul.f32 -1.442695, %v728_v12 }
 0xbeb   :  { %1402 = vpow2.f32 %v1132_v16 }
 0xbf3   :  { %v1401_v15 = vpop.eup %1400 }
 0xbf4   :  { %738 = vrot.lane.b32.xlu0 %v1401_v15, %s1459_s0 }
 0xbf5   :  { %v1403_v17 = vpop.eup %1402 }
 0xbf6   :  { %v732_v18 = vadd.f32 1.0, %v1403_v17 }
 0xbf8   :  { %1404 = vrcp.f32 %v732_v18 }
 0xc02   :  { %v1405_v19 = vpop.eup %1404 }
 0xc03   :  { %v736_v22 = vmul.f32 %v1405_v19, %v634_v4 }
 0xc66   :  { %v739_v20 = vpop.permute.xlu0 %738 }
 0xc67   :  { %v741_v21 = vmul.f32 %v1405_v19, %v739_v20 }
 0xc69   :  { %743 = vrot.lane.b32.xlu1 %v741_v21, %s1460_s3 }
 0xcdb   :  { %v744_v23 = vpop.permute.xlu1 %743 }
 0xcdc   :  { %v746_v24 = vadd.f32 %v744_v23, %v736_v22 }
 0xcde   :  { %1406 = vtanh.f32 %v746_v24 }
 0xce8   :  { %v1407_v32 = vpop.eup %1406 }
 0xce9   :  { %749 = vrot.lane.b32.xlu0 %v1407_v32, %s1459_s0 }
 0xd5b   :  { %v750_v39 = vpop.permute.xlu0 %749 }
 0xd5c   :  { %v752_v44 = vmul.f32 %v1405_v19, %v750_v39 }
 0xd5e   :  { %754 = vrot.lane.b32.xlu1 %v752_v44, %s1460_s3 }
 0xdd0   :  { %v755_v25 = vpop.permute.xlu1 %754 }
 0xdd1   :  { %1133 = vst.msk [vmem:[%s1806_s4 + $0x20] sm:$0xff] %vm302_vm3, %v755_v25  ;;  %1282 = vmatmul.mubr.msk.f32.vlgmr.msra.gmra.mrb[6].mxu1 %vm39_vm0, %v755_v25 }
 0xdd2   :  { %1134 = vst.msk [vmem:[%s1806_s4 + $0x18] sm:$0xff] %vm305_vm4, %v755_v25  ;;  %1358 = vmatpush3.bf16.msra.mxu1 %v1517_v11  ;;  %1303 = vmatprep.mubr.msk.f32.mxu1 %vm1457_vm1, %v1458_v8 }
 0xdd3   :  { %1359 = vmatprep.subr.bf16.mxu1 %v1456_v6 }
 0xdd6   :  { %1361 = vmatpush3.bf16.msra.mxu1 %v1526_v14 }
 0xea4   :  { %v834_v27 = vpop.f32.mrb[6].mxu1 }
 0xea5   :  { %v838_v28 = vadd.f32 %v834_v27, %v761_v41  ;;  %v1283_v29 = vpop.f32.mrb[7].mxu1 }
 0xea7   :  { %1408 = vtanh.f32 %v838_v28  ;;  %v1136_v11 = vmul.f32 -1.442695, %v838_v28 }
 0xea9   :  { %1410 = vpow2.f32 %v1136_v11 }
 0xeb1   :  { %v1409_v30 = vpop.eup %1408 }
 0xeb2   :  { %848 = vrot.lane.b32.xlu0 %v1409_v30, %s1459_s0 }
 0xeb3   :  { %v1411_v31 = vpop.eup %1410 }
 0xeb4   :  { %v842_v8 = vadd.f32 1.0, %v1411_v31 }
 0xeb6   :  { %1412 = vrcp.f32 %v842_v8 }
 0xec0   :  { %v1413_v6 = vpop.eup %1412 }
 0xec1   :  { %v846_v35 = vmul.f32 %v1413_v6, %v746_v24 }
 0xf24   :  { %v849_v33 = vpop.permute.xlu0 %848 }
 0xf25   :  { %v851_v14 = vmul.f32 %v1413_v6, %v849_v33 }
 0xf27   :  { %853 = vrot.lane.b32.xlu1 %v851_v14, %s1460_s3 }
 0xf99   :  { %v854_v38 = vpop.permute.xlu1 %853 }
 0xf9a   :  { %v856_v42 = vadd.f32 %v854_v38, %v846_v35 }
 0xf9c   :  { %1414 = vtanh.f32 %v856_v42 }
 0xfa6   :  { %v1415_v34 = vpop.eup %1414 }
 0xfa7   :  { %859 = vrot.lane.b32.xlu0 %v1415_v34, %s1459_s0 }
0x1019   :  { %v860_v37 = vpop.permute.xlu0 %859 }
0x101a   :  { %v862_v41 = vmul.f32 %v1413_v6, %v860_v37 }
0x101c   :  { %864 = vrot.lane.b32.xlu1 %v862_v41, %s1460_s3 }
0x108e   :  { %v865_v47 = vpop.permute.xlu1 %864 }
0x108f   :  { %1137 = vst.msk [vmem:[%s1806_s4 + $0x28] sm:$0xff] %vm302_vm3, %v865_v47  ;;  %1293 = vmatmul.mubr.msk.f32.vlgmr.msra.gmra.mrb[12].mxu0 %vm39_vm0, %v865_v47 }
0x1090   :  { %1138 = vst.msk [vmem:[%s1806_s4 + $0x10] sm:$0xff] %vm305_vm4, %v865_v47 }
0x1162   :  { %v944_v49 = vpop.f32.mrb[12].mxu0 }
0x1163   :  { %v948_v51 = vadd.f32 %v944_v49, %v871_v53  ;;  %v1294_v40 = vpop.f32.mrb[13].mxu0 }
0x1165   :  { %1416 = vtanh.f32 %v948_v51  ;;  %v1140_v54 = vmul.f32 -1.442695, %v948_v51 }
0x1167   :  { %1418 = vpow2.f32 %v1140_v54 }
0x116f   :  { %v1417_v52 = vpop.eup %1416 }
0x1170   :  { %958 = vrot.lane.b32.xlu0 %v1417_v52, %s1459_s0 }
0x1171   :  { %v1419_v55 = vpop.eup %1418 }
0x1172   :  { %v952_v56 = vadd.f32 1.0, %v1419_v55 }
0x1174   :  { %1420 = vrcp.f32 %v952_v56 }
0x117e   :  { %v1421_v57 = vpop.eup %1420 }
0x117f   :  { %v956_v60 = vmul.f32 %v1421_v57, %v856_v42 }
0x11e2   :  { %v959_v58 = vpop.permute.xlu0 %958 }
0x11e3   :  { %v961_v59 = vmul.f32 %v1421_v57, %v959_v58 }
0x11e5   :  { %963 = vrot.lane.b32.xlu1 %v961_v59, %s1460_s3 }
0x1257   :  { %v964_v61 = vpop.permute.xlu1 %963 }
0x1258   :  { %v966_v62 = vadd.f32 %v964_v61, %v956_v60 }
0x125a   :  { %1422 = vtanh.f32 %v966_v62 }
0x1264   :  { %v1423_v26 = vpop.eup %1422 }
0x1265   :  { %969 = vrot.lane.b32.xlu0 %v1423_v26, %s1459_s0 }
0x12d7   :  { %v970_v48 = vpop.permute.xlu0 %969 }
0x12d8   :  { %v972_v53 = vmul.f32 %v1421_v57, %v970_v48 }
0x12da   :  { %974 = vrot.lane.b32.xlu1 %v972_v53, %s1460_s3 }
0x134c   :  { %v975_v63 = vpop.permute.xlu1 %974 }
0x134d   :  { %1141 = vst.msk [vmem:[%s1806_s4 + $0x30] sm:$0xff] %vm302_vm3, %v975_v63  ;;  %1304 = vmatmul.mubr.msk.f32.vlgmr.msra.gmra.mrb[8].mxu1 %vm39_vm0, %v975_v63 }
0x134e   :  { %1142 = vst.msk [vmem:[%s1806_s4 + $0x8] sm:$0xff] %vm305_vm4, %v975_v63 }
0x1420   :  { %v1054_v0 = vpop.f32.mrb[8].mxu1 }
0x1421   :  { %v1058_v1 = vadd.f32 %v1054_v0, %v981_v50  ;;  %v1305_v2 = vpop.f32.mrb[9].mxu1 }
0x1423   :  { %1424 = vtanh.f32 %v1058_v1  ;;  %v1144_v4 = vmul.f32 -1.442695, %v1058_v1 }
0x1425   :  { %1426 = vpow2.f32 %v1144_v4 }
0x142d   :  { %v1425_v3 = vpop.eup %1424 }
0x142e   :  { %1068 = vrot.lane.b32.xlu0 %v1425_v3, %s1459_s0 }
0x142f   :  { %v1427_v43 = vpop.eup %1426 }
0x1430   :  { %v1062_v5 = vadd.f32 1.0, %v1427_v43 }
0x1432   :  { %1428 = vrcp.f32 %v1062_v5 }
0x143c   :  { %v1429_v7 = vpop.eup %1428 }
0x143d   :  { %v1066_v36 = vmul.f32 %v1429_v7, %v966_v62 }
0x14a0   :  { %v1069_v9 = vpop.permute.xlu0 %1068 }
0x14a1   :  { %v1071_v10 = vmul.f32 %v1429_v7, %v1069_v9 }
0x14a3   :  { %1073 = vrot.lane.b32.xlu1 %v1071_v10, %s1460_s3 }
0x1515   :  { %v1074_v12 = vpop.permute.xlu1 %1073 }
0x1516   :  { %v1076_v13 = vadd.f32 %v1074_v12, %v1066_v36 }
0x1518   :  { %1430 = vtanh.f32 %v1076_v13 }
0x1522   :  { %v1431_v45 = vpop.eup %1430 }
0x1523   :  { %1079 = vrot.lane.b32.xlu0 %v1431_v45, %s1459_s0  ;;  %s1432_s0 = scalar_lea.vmem %s1099_s27, 128 }
0x1524   :  { %p1433_p0 = scmp.ne.s32.totalorder %s1099_s27, %s1432_s0  ;;  %p1438_p2 = scmp.lt.s32.totalorder %s1432_s0, %s1432_s0 }
0x1526   :  { %p1439_p3 = por %p1438_p2, %p1437_p1 }
0x1528   :  { %p1440_p4 = pnand %p1439_p3, %p1433_p0 }
0x1595   :  { %v1080_v46 = vpop.permute.xlu0 %1079 }
0x1596   :  { %v1082_v50 = vmul.f32 %v1429_v7, %v1080_v46 }
0x1598   :  { %1084 = vrot.lane.b32.xlu1 %v1082_v50, %s1460_s3 }
0x160a   :  { %v1085_v15 = vpop.permute.xlu1 %1084 }
0x160b   :  { %1145 = vst.msk [vmem:[%s1806_s4 + $0x38] sm:$0xff] %vm302_vm3, %v1085_v15 }
0x160c   :  { %1088 = vst.msk [vmem:[%s1806_s4] sm:$0xff] %vm305_vm4, %v1085_v15 }
0x160d   :  { %1089 = vst.msk [vmem:[#allocation3] sm:$0xff] %vm39_vm0, %v1085_v15 }
0x160e   :  { %1443 = shalt.err (!%p1440_p4)
}
0x160f   :  { %s1444_s7 = scalar_lea.hbm %s1807_s5, 128 }
0x1610   :  { %p1445_p5 = scmp.ne.s32.totalorder %s1807_s5, %s1444_s7  ;;  %p1448_p6 = scmp.lt.u32.totalorder %s1444_s7, %s1807_s5 }
0x1612   :  { %p1450_p7 = pnand %p1448_p6, %p1445_p5 }
0x1614   :  { %1453 = shalt.err (!%p1450_p7)
}
0x1615   :  { %1101 = dma.vmem_to_hbm [thread:$0]  %s1099_s27, 128, %s1807_s5, [#allocation4]  }
0x1616   :  { %1454 = dma.done.wait [#allocation4], 128  }
0x1617   :  { %1455 = vsyncadd [#allocation4], 4294967168 }
0x1618   :  { %1107 = vsyncpa [#allocation4], 1 }

</bundles_post_ra>
